<compile_context>
chip_gen: v6e
topology: v6e:2x2x1
jax: 0.10.0
libtpu: 0.0.40
codegen_flags: <defaults>
</compile_context>

<pallas_src>
import jax
import jax.numpy as jnp
import numpy as np
from jax.experimental import pallas as pl
from jax.experimental.pallas import tpu as pltpu

# ----------------------------------------------------------------------------
# Hyper-parameters (StateEncoder defaults at small sizes)
# ----------------------------------------------------------------------------
NUM_NODES    = 10            # node vocabulary, ids 1..NUM_NODES, 0 = padding
TIME_HORIZON = 7             # -> max sequence length L = 8
EMBED_SIZE   = 16            # embedding_size
HIDDEN_SIZE  = 32            # hidden_size == Gated_CNN num_kernels
RELEVANT_V   = 64            # relevant_v_size
NUM_DEFENDER = 2             # enables the position (p_feature) branch
KERNEL_SIZE  = 3             # Gated_CNN kernel_size = [3]
MAX_LEN      = TIME_HORIZON + 1              # L = 8
L_OUT        = MAX_LEN - KERNEL_SIZE + 1     # 6 valid conv output positions
LP           = 8                             # conv-output rows padded to 8 sublanes
NV           = NUM_NODES + 1                 # vocab size incl. padding id 0 (=11)
V_PAD        = 128                           # lane-dense output width (>= RELEVANT_V)
BATCH        = 2

# ---- packed weight-slab row offsets (all full 128 lanes, sublane aligned) ----
R_CG   = 0                   # (128,128)  one-hot(window ids) -> [conv | gate]
R_P1   = 128                 # (128,128)  one-hot(positions)  -> fc_p_1
R_P2   = 256                 # (128,128)  fc_p_2 (rows/cols 0:32 used)
R_T2   = 384                 # (128,128)  fc_t_2 (rows/cols 0:8 used)
R_WH   = 512                 # ( 32,128)  fc1 weight, h part (cols 0:64 used)
R_WP   = 544                 # (128,128)  fc1 weight, p part (rows 0:32 used)
R_WT   = 672                 # (128,128)  fc1 weight, t part (rows 0:8 used)
R_BIAS = 800                 # (  8,128)  bias rows: cg_b,t1_w,t1_b,t2_b,p1_b,p2_b,fc1_b,0
SLAB_ROWS = R_BIAS + 8       # 808


# ----------------------------------------------------------------------------
# Pallas kernel: fused gather + gated-conv, maxpool, t/p MLPs, fused fc1
# ----------------------------------------------------------------------------
def state_encoder_kernel(ids_ref, norm_t_ref, w_ref, out_ref):
    # ids_ref:    (K+1, B, LP) int32; rows 0..K-1 = windowed history taps,
    #             row K = defender positions (cols 0:NUM_DEFENDER).
    # norm_t_ref: (B, 1) f32
    # w_ref:      (SLAB_ROWS, 128) f32 packed weights/biases
    # out_ref:    (B, 128) f32 (lane-dense; cols >= RELEVANT_V are zero)
    B = out_ref.shape[0]
    C = HIDDEN_SIZE

    bias   = w_ref[R_BIAS:R_BIAS + 8, :]     # (8,128), single aligned load
    cg_b   = bias[0:1, :]
    t1_w   = bias[1:2, :]
    t1_b   = bias[2:3, :]
    t2_b   = bias[3:4, :]
    p1_b   = bias[4:5, :]
    p2_b   = bias[5:6, :]
    fc1_b  = bias[6:7, :]

    # --- Gated_CNN branch: lane-dense one-hot of the K-tap windows, one matmul ---
    lane3 = jax.lax.broadcasted_iota(jnp.int32, (B, LP, 128), 2)
    oh = jnp.zeros((B, LP, 128), jnp.float32)
    for k in range(KERNEL_SIZE):                      # static unroll (K = 3)
        tap = ids_ref[k]                              # (B, LP) int32
        oh = oh + (lane3 == (tap[:, :, None] + k * NV)).astype(jnp.float32)
    oh2 = oh.reshape(B * LP, 128)                     # tile-aligned collapse
    cg = (jnp.dot(oh2, w_ref[R_CG:R_CG + 128, :],
                  preferred_element_type=jnp.float32) + cg_b)        # (B*LP, 128)
    gated = cg[:, :C] * jax.nn.sigmoid(cg[:, C:2 * C])               # (B*LP, C)

    # max_pool1d over the sequence; padded rows (l >= L_OUT) masked to 0.0,
    # which is equivalent to -inf because of the trailing ReLU.
    gated = gated.reshape(B, LP, C)
    lidx = jax.lax.broadcasted_iota(jnp.int32, (B, LP, C), 1)
    gated = jnp.where(lidx < L_OUT, gated, 0.0)
    h = jnp.maximum(jnp.max(gated, axis=1), 0.0)                     # (B, C)

    # --- time branch: 128-wide zero-padded, fc_t_2 as one MXU dot -------------
    t = jnp.maximum(norm_t_ref[...] * t1_w + t1_b, 0.0)              # (B, 128)
    t = jnp.maximum(jnp.dot(t, w_ref[R_T2:R_T2 + 128, :],
                            preferred_element_type=jnp.float32) + t2_b, 0.0)

    # --- defender position branch: lane-dense one-hot + fused fc_p_1, fc_p_2 --
    lane2 = jax.lax.broadcasted_iota(jnp.int32, (B, 128), 1)
    pos = ids_ref[KERNEL_SIZE]                                       # (B, LP)
    pos_oh = jnp.zeros((B, 128), jnp.float32)
    for d in range(NUM_DEFENDER):                     # static unroll (D = 2)
        pos_oh = pos_oh + (lane2 == (pos[:, d:d + 1] + d * NV)).astype(jnp.float32)
    p = jnp.maximum(jnp.dot(pos_oh, w_ref[R_P1:R_P1 + 128, :],
                            preferred_element_type=jnp.float32) + p1_b, 0.0)
    p = jnp.maximum(jnp.dot(p, w_ref[R_P2:R_P2 + 128, :],
                            preferred_element_type=jnp.float32) + p2_b, 0.0)

    # --- fc1: three accumulating dots (no lane concat), lane-dense 128 store --
    out_ref[...] = (
        jnp.dot(h, w_ref[R_WH:R_WH + HIDDEN_SIZE, :],
                preferred_element_type=jnp.float32)
        + jnp.dot(p, w_ref[R_WP:R_WP + 128, :],
                  preferred_element_type=jnp.float32)
        + jnp.dot(t, w_ref[R_WT:R_WT + 128, :],
                  preferred_element_type=jnp.float32)
        + fc1_b)


# ----------------------------------------------------------------------------
# Wrapper: pack the int ids (pad + static slices + stack -> one tiny fusion)
# and call the kernel with 3 input DMAs + 1 output DMA.
# ----------------------------------------------------------------------------
@jax.jit
def state_encoder_forward(w_slab, hist_idx, pos_idx, norm_t):
    B, L = hist_idx.shape
    K = KERNEL_SIZE
    assert L <= LP

    hist = hist_idx.astype(jnp.int32)
    hist_p = jnp.pad(hist, ((0, 0), (0, LP + K - 1 - L)))            # (B, LP+K-1)
    taps = [hist_p[:, k:k + LP] for k in range(K)]                   # K x (B, LP)
    pos_row = jnp.pad(pos_idx.astype(jnp.int32),
                      ((0, 0), (0, LP - pos_idx.shape[1])))          # (B, LP)
    ids = jnp.stack(taps + [pos_row], axis=0)                        # (K+1, B, LP)

    vmem = pl.BlockSpec(memory_space=pltpu.MemorySpace.VMEM)
    out = pl.pallas_call(
        state_encoder_kernel,
        out_shape=jax.ShapeDtypeStruct((B, V_PAD), jnp.float32),
        in_specs=[vmem, vmem, vmem],
        out_specs=vmem,
    )(ids, norm_t.astype(jnp.float32), w_slab)
    return out[:, :RELEVANT_V]


# ----------------------------------------------------------------------------
# Deterministic parameter init (shapes from StateEncoder.__init__)
# ----------------------------------------------------------------------------
def init_params(key):
    ks = jax.random.split(key, 16)
    E, H, V, D, K = EMBED_SIZE, HIDDEN_SIZE, RELEVANT_V, NUM_DEFENDER, KERNEL_SIZE
    C = HIDDEN_SIZE

    def lin(k, shape, fan_in):
        s = 1.0 / np.sqrt(fan_in)
        return jax.random.uniform(k, shape, jnp.float32, -s, s)

    emb_seq = jax.random.normal(ks[0], (NV, E), jnp.float32) * 0.5
    emb_seq = emb_seq.at[0].set(0.0)        # padding_idx=0
    emb_p = jax.random.normal(ks[1], (NV, E), jnp.float32) * 0.5
    emb_p = emb_p.at[0].set(0.0)

    params = dict(
        emb_seq=emb_seq,
        emb_p=emb_p,
        conv_w=lin(ks[2], (K, E, C), E * K),
        conv_b=lin(ks[3], (1, C), E * K),
        gate_w=lin(ks[4], (K, E, C), E * K),
        gate_b=lin(ks[5], (1, C), E * K),
        t1_w=lin(ks[6], (1, 8), 1),
        t1_b=lin(ks[7], (1, 8), 1),
        t2_w=lin(ks[8], (8, 8), 8),
        t2_b=lin(ks[9], (1, 8), 8),
        p1_w=lin(ks[10], (E * D, H), E * D),
        p1_b=lin(ks[11], (1, H), E * D),
        p2_w=lin(ks[12], (H, H), H),
        p2_b=lin(ks[13], (1, H), H),
    )
    fc1_w = lin(ks[14], (2 * H + 8, V), 2 * H + 8)          # concat order: h | p | t
    params['w_h'] = fc1_w[:H]
    params['w_p'] = fc1_w[H:2 * H]
    params['w_t'] = fc1_w[2 * H:]
    params['fc1_b'] = lin(ks[15], (1, V), 2 * H + 8)
    return params


# ----------------------------------------------------------------------------
# Offline weight fusion + packing into one lane-dense (808, 128) f32 slab
# ----------------------------------------------------------------------------
def prepare_kernel_params(params):
    E, H, D, K = EMBED_SIZE, HIDDEN_SIZE, NUM_DEFENDER, KERNEL_SIZE

    def block(w, rows=128):
        w = jnp.asarray(w, jnp.float32)
        return jnp.pad(w, ((0, rows - w.shape[0]), (0, 128 - w.shape[1])))

    def brow(x):
        x = jnp.asarray(x, jnp.float32)
        return jnp.pad(x, ((0, 0), (0, 128 - x.shape[1])))

    # embedding -> [conv | gate] fused per-tap weight, stacked over taps (K*NV rows)
    cg_tap = jnp.concatenate([params['conv_w'], params['gate_w']], axis=-1)   # (K,E,2H)
    cg = jnp.concatenate([params['emb_seq'] @ cg_tap[k] for k in range(K)], axis=0)
    # embedding_p -> fc_p_1 fused weight, stacked over defenders (D*NV rows)
    p1 = jnp.concatenate(
        [params['emb_p'] @ params['p1_w'][d * E:(d + 1) * E] for d in range(D)],
        axis=0)

    slab = jnp.concatenate([
        block(cg),                      # R_CG
        block(p1),                      # R_P1
        block(params['p2_w']),          # R_P2
        block(params['t2_w']),          # R_T2
        block(params['w_h'], rows=H),   # R_WH
        block(params['w_p']),           # R_WP
        block(params['w_t']),           # R_WT
        brow(jnp.concatenate([params['conv_b'], params['gate_b']], axis=-1)),  # cg_b
        brow(params['t1_w']),
        brow(params['t1_b']),
        brow(params['t2_b']),
        brow(params['p1_b']),
        brow(params['p2_b']),
        brow(params['fc1_b']),
        jnp.zeros((1, 128), jnp.float32),
    ], axis=0)
    assert slab.shape == (SLAB_ROWS, 128)
    return slab


# ----------------------------------------------------------------------------
# Pure-JAX reference of the same forward pass (for verification)
# ----------------------------------------------------------------------------
def reference_forward(params, hist_idx, pos_idx, norm_t):
    emb_seq = params['emb_seq'][hist_idx]                   # (B, L, E)
    B, L, E = emb_seq.shape
    K, C = KERNEL_SIZE, HIDDEN_SIZE
    Lout = L - K + 1
    conv = jnp.zeros((B, Lout, C), jnp.float32)
    gate = jnp.zeros((B, Lout, C), jnp.float32)
    for k in range(K):
        xs = emb_seq[:, k:k + Lout, :]
        conv = conv + jnp.einsum('ble,ec->blc', xs, params['conv_w'][k])
        gate = gate + jnp.einsum('ble,ec->blc', xs, params['gate_w'][k])
    conv = conv + params['conv_b']
    gate = gate + params['gate_b']
    gated = conv * jax.nn.sigmoid(gate)
    h = jax.nn.relu(jnp.max(gated, axis=1))                 # (B, C)
    t = jax.nn.relu(norm_t @ params['t1_w'] + params['t1_b'])
    t = jax.nn.relu(t @ params['t2_w'] + params['t2_b'])
    p = params['emb_p'][pos_idx].reshape(B, -1)
    p = jax.nn.relu(p @ params['p1_w'] + params['p1_b'])
    p = jax.nn.relu(p @ params['p2_w'] + params['p2_b'])
    return (h @ params['w_h'] + p @ params['w_p'] + t @ params['w_t']
            + params['fc1_b'])


# ----------------------------------------------------------------------------
if __name__ == "__main__":
    key = jax.random.PRNGKey(0)
    params = init_params(key)
    w_slab = prepare_kernel_params(params)

    # Two synthetic states: (attacker_history node ids, defender positions).
    histories = [[3, 5, 2, 7], [1, 4, 6, 9, 2, 8]]
    positions = [[2, 9], [4, 1]]

    # Emulate pad_sequence(batch_first=True, padding_value=0)[:-1] with the
    # length-MAX_LEN time_indicator row driving the padded length.
    hist_idx = np.zeros((BATCH, MAX_LEN), dtype=np.int32)
    for b, hseq in enumerate(histories):
        assert len(hseq) <= MAX_LEN
        hist_idx[b, :len(hseq)] = hseq
    pos_idx = np.array(positions, dtype=np.int32)           # (B, NUM_DEFENDER)
    norm_t = np.array([[(len(hseq) - 1) / TIME_HORIZON] for hseq in histories],
                      dtype=np.float32)                     # (B, 1)

    hist_idx = jnp.asarray(hist_idx)
    pos_idx = jnp.asarray(pos_idx)
    norm_t = jnp.asarray(norm_t)

    out = state_encoder_forward(w_slab, hist_idx, pos_idx, norm_t)
    out = jax.block_until_ready(out)

    ref = reference_forward(params, hist_idx, pos_idx, norm_t)
    assert out.shape == (BATCH, RELEVANT_V)
    np.testing.assert_allclose(np.asarray(out), np.asarray(ref),
                               rtol=1e-3, atol=1e-3)
    print("KERNEL_OK")
</pallas_src>

<mosaic_0001>
module attributes {stable_mosaic.version = 11 : i64} {
  func.func @state_encoder_kernel(%arg0: memref<4x2x8xi32, #tpu.memory_space<vmem>>, %arg1: memref<2x1xf32, #tpu.memory_space<vmem>>, %arg2: memref<808x128xf32, #tpu.memory_space<vmem>>, %arg3: memref<2x128xf32, #tpu.memory_space<vmem>>) attributes {dimension_semantics = [], scalar_prefetch = 0 : i64, scratch_operands = 0 : i64, tpu.core_type = #tpu.core_type<tc>} {
    %c800 = arith.constant 800 : index
    %c0 = arith.constant 0 : index
    %0 = vector.load %arg2[%c800, %c0] : memref<808x128xf32, #tpu.memory_space<vmem>>, vector<8x128xf32>
    %1 = vector.extract_strided_slice %0 {offsets = [0, 0], sizes = [1, 128], strides = [1, 1]} : vector<8x128xf32> to vector<1x128xf32>
    %2 = vector.extract_strided_slice %0 {offsets = [1, 0], sizes = [1, 128], strides = [1, 1]} : vector<8x128xf32> to vector<1x128xf32>
    %3 = vector.extract_strided_slice %0 {offsets = [2, 0], sizes = [1, 128], strides = [1, 1]} : vector<8x128xf32> to vector<1x128xf32>
    %4 = vector.extract_strided_slice %0 {offsets = [3, 0], sizes = [1, 128], strides = [1, 1]} : vector<8x128xf32> to vector<1x128xf32>
    %5 = vector.extract_strided_slice %0 {offsets = [4, 0], sizes = [1, 128], strides = [1, 1]} : vector<8x128xf32> to vector<1x128xf32>
    %6 = vector.extract_strided_slice %0 {offsets = [5, 0], sizes = [1, 128], strides = [1, 1]} : vector<8x128xf32> to vector<1x128xf32>
    %7 = vector.extract_strided_slice %0 {offsets = [6, 0], sizes = [1, 128], strides = [1, 1]} : vector<8x128xf32> to vector<1x128xf32>
    %8 = tpu.iota {dimensions = array<i32: 2>} : vector<2x8x128xi32>
    %cst = arith.constant 0.000000e+00 : f32
    %9 = vector.broadcast %cst : f32 to vector<2x8x128xf32>
    %c0_0 = arith.constant 0 : index
    %c0_1 = arith.constant 0 : index
    %c0_2 = arith.constant 0 : index
    %10 = vector.load %arg0[%c0_0, %c0_1, %c0_2] : memref<4x2x8xi32, #tpu.memory_space<vmem>>, vector<1x2x8xi32>
    %11 = vector.shape_cast %10 : vector<1x2x8xi32> to vector<2x8xi32>
    %12 = vector.shape_cast %11 : vector<2x8xi32> to vector<2x8x1xi32>
    %c0_i32 = arith.constant 0 : i32
    %13 = vector.broadcast %c0_i32 : i32 to vector<2x8x1xi32>
    %14 = arith.addi %12, %13 : vector<2x8x1xi32>
    %15 = vector.broadcast %14 : vector<2x8x1xi32> to vector<2x8x128xi32>
    %16 = arith.cmpi eq, %8, %15 : vector<2x8x128xi32>
    %17 = arith.extui %16 : vector<2x8x128xi1> to vector<2x8x128xi32>
    %18 = arith.sitofp %17 : vector<2x8x128xi32> to vector<2x8x128xf32>
    %19 = arith.addf %9, %18 : vector<2x8x128xf32>
    %c1 = arith.constant 1 : index
    %c0_3 = arith.constant 0 : index
    %c0_4 = arith.constant 0 : index
    %20 = vector.load %arg0[%c1, %c0_3, %c0_4] : memref<4x2x8xi32, #tpu.memory_space<vmem>>, vector<1x2x8xi32>
    %21 = vector.shape_cast %20 : vector<1x2x8xi32> to vector<2x8xi32>
    %22 = vector.shape_cast %21 : vector<2x8xi32> to vector<2x8x1xi32>
    %c11_i32 = arith.constant 11 : i32
    %23 = vector.broadcast %c11_i32 : i32 to vector<2x8x1xi32>
    %24 = arith.addi %22, %23 : vector<2x8x1xi32>
    %25 = vector.broadcast %24 : vector<2x8x1xi32> to vector<2x8x128xi32>
    %26 = arith.cmpi eq, %8, %25 : vector<2x8x128xi32>
    %27 = arith.extui %26 : vector<2x8x128xi1> to vector<2x8x128xi32>
    %28 = arith.sitofp %27 : vector<2x8x128xi32> to vector<2x8x128xf32>
    %29 = arith.addf %19, %28 : vector<2x8x128xf32>
    %c2 = arith.constant 2 : index
    %c0_5 = arith.constant 0 : index
    %c0_6 = arith.constant 0 : index
    %30 = vector.load %arg0[%c2, %c0_5, %c0_6] : memref<4x2x8xi32, #tpu.memory_space<vmem>>, vector<1x2x8xi32>
    %31 = vector.shape_cast %30 : vector<1x2x8xi32> to vector<2x8xi32>
    %32 = vector.shape_cast %31 : vector<2x8xi32> to vector<2x8x1xi32>
    %c22_i32 = arith.constant 22 : i32
    %33 = vector.broadcast %c22_i32 : i32 to vector<2x8x1xi32>
    %34 = arith.addi %32, %33 : vector<2x8x1xi32>
    %35 = vector.broadcast %34 : vector<2x8x1xi32> to vector<2x8x128xi32>
    %36 = arith.cmpi eq, %8, %35 : vector<2x8x128xi32>
    %37 = arith.extui %36 : vector<2x8x128xi1> to vector<2x8x128xi32>
    %38 = arith.sitofp %37 : vector<2x8x128xi32> to vector<2x8x128xf32>
    %39 = arith.addf %29, %38 : vector<2x8x128xf32>
    %40 = vector.shape_cast %39 : vector<2x8x128xf32> to vector<16x128xf32>
    %c0_7 = arith.constant 0 : index
    %c0_8 = arith.constant 0 : index
    %41 = vector.load %arg2[%c0_7, %c0_8] : memref<808x128xf32, #tpu.memory_space<vmem>>, vector<128x128xf32>
    %cst_9 = arith.constant dense<0.000000e+00> : vector<16x128xf32>
    %42 = tpu.matmul %40, %41, %cst_9 {dimension_numbers = #tpu.dot_dimension_numbers<[1], [0], [0], [1], [0, 0, 1, 1], [], []>} : vector<16x128xf32>, vector<128x128xf32>, vector<16x128xf32> -> vector<16x128xf32>
    %43 = vector.broadcast %1 : vector<1x128xf32> to vector<16x128xf32>
    %44 = arith.addf %42, %43 : vector<16x128xf32>
    %45 = vector.extract_strided_slice %44 {offsets = [0, 0], sizes = [16, 32], strides = [1, 1]} : vector<16x128xf32> to vector<16x32xf32>
    %46 = vector.extract_strided_slice %44 {offsets = [0, 32], sizes = [16, 32], strides = [1, 1]} : vector<16x128xf32> to vector<16x32xf32>
    %47 = arith.negf %46 : vector<16x32xf32>
    %48 = math.exp %47 : vector<16x32xf32>
    %cst_10 = arith.constant 1.000000e+00 : f32
    %49 = vector.broadcast %cst_10 : f32 to vector<16x32xf32>
    %50 = arith.addf %49, %48 : vector<16x32xf32>
    %51 = arith.divf %49, %50 : vector<16x32xf32>
    %52 = arith.mulf %45, %51 : vector<16x32xf32>
    %53 = vector.shape_cast %52 : vector<16x32xf32> to vector<2x8x32xf32>
    %54 = tpu.iota {dimensions = array<i32: 1>} : vector<2x8x32xi32>
    %c6_i32 = arith.constant 6 : i32
    %55 = vector.broadcast %c6_i32 : i32 to vector<2x8x32xi32>
    %56 = arith.cmpi slt, %54, %55 : vector<2x8x32xi32>
    %cst_11 = arith.constant 0.000000e+00 : f32
    %57 = vector.broadcast %cst_11 : f32 to vector<2x8x32xf32>
    %58 = arith.select %56, %53, %57 : vector<2x8x32xi1>, vector<2x8x32xf32>
    %cst_12 = arith.constant dense<0xFF800000> : vector<2x32xf32>
    %59 = vector.multi_reduction <maximumf>, %58, %cst_12 [1] : vector<2x8x32xf32> to vector<2x32xf32>
    %cst_13 = arith.constant 0.000000e+00 : f32
    %60 = vector.broadcast %cst_13 : f32 to vector<2x32xf32>
    %61 = arith.maximumf %59, %60 : vector<2x32xf32>
    %c0_14 = arith.constant 0 : index
    %c0_15 = arith.constant 0 : index
    %62 = vector.load %arg1[%c0_14, %c0_15] : memref<2x1xf32, #tpu.memory_space<vmem>>, vector<2x1xf32>
    %63 = vector.broadcast %62 : vector<2x1xf32> to vector<2x128xf32>
    %64 = vector.broadcast %2 : vector<1x128xf32> to vector<2x128xf32>
    %65 = arith.mulf %63, %64 : vector<2x128xf32>
    %66 = vector.broadcast %3 : vector<1x128xf32> to vector<2x128xf32>
    %67 = arith.addf %65, %66 : vector<2x128xf32>
    %cst_16 = arith.constant 0.000000e+00 : f32
    %68 = vector.broadcast %cst_16 : f32 to vector<2x128xf32>
    %69 = arith.maximumf %67, %68 : vector<2x128xf32>
    %c384 = arith.constant 384 : index
    %c0_17 = arith.constant 0 : index
    %70 = vector.load %arg2[%c384, %c0_17] : memref<808x128xf32, #tpu.memory_space<vmem>>, vector<128x128xf32>
    %cst_18 = arith.constant dense<0.000000e+00> : vector<2x128xf32>
    %71 = tpu.matmul %69, %70, %cst_18 {dimension_numbers = #tpu.dot_dimension_numbers<[1], [0], [0], [1], [0, 0, 1, 1], [], []>} : vector<2x128xf32>, vector<128x128xf32>, vector<2x128xf32> -> vector<2x128xf32>
    %72 = vector.broadcast %4 : vector<1x128xf32> to vector<2x128xf32>
    %73 = arith.addf %71, %72 : vector<2x128xf32>
    %cst_19 = arith.constant 0.000000e+00 : f32
    %74 = vector.broadcast %cst_19 : f32 to vector<2x128xf32>
    %75 = arith.maximumf %73, %74 : vector<2x128xf32>
    %76 = tpu.iota {dimensions = array<i32: 1>} : vector<2x128xi32>
    %c3 = arith.constant 3 : index
    %c0_20 = arith.constant 0 : index
    %c0_21 = arith.constant 0 : index
    %77 = vector.load %arg0[%c3, %c0_20, %c0_21] : memref<4x2x8xi32, #tpu.memory_space<vmem>>, vector<1x2x8xi32>
    %78 = vector.shape_cast %77 : vector<1x2x8xi32> to vector<2x8xi32>
    %cst_22 = arith.constant 0.000000e+00 : f32
    %79 = vector.broadcast %cst_22 : f32 to vector<2x128xf32>
    %80 = vector.extract_strided_slice %78 {offsets = [0, 0], sizes = [2, 1], strides = [1, 1]} : vector<2x8xi32> to vector<2x1xi32>
    %c0_i32_23 = arith.constant 0 : i32
    %81 = vector.broadcast %c0_i32_23 : i32 to vector<2x1xi32>
    %82 = arith.addi %80, %81 : vector<2x1xi32>
    %83 = vector.broadcast %82 : vector<2x1xi32> to vector<2x128xi32>
    %84 = arith.cmpi eq, %76, %83 : vector<2x128xi32>
    %85 = arith.extui %84 : vector<2x128xi1> to vector<2x128xi32>
    %86 = arith.sitofp %85 : vector<2x128xi32> to vector<2x128xf32>
    %87 = arith.addf %79, %86 : vector<2x128xf32>
    %88 = vector.extract_strided_slice %78 {offsets = [0, 1], sizes = [2, 1], strides = [1, 1]} : vector<2x8xi32> to vector<2x1xi32>
    %c11_i32_24 = arith.constant 11 : i32
    %89 = vector.broadcast %c11_i32_24 : i32 to vector<2x1xi32>
    %90 = arith.addi %88, %89 : vector<2x1xi32>
    %91 = vector.broadcast %90 : vector<2x1xi32> to vector<2x128xi32>
    %92 = arith.cmpi eq, %76, %91 : vector<2x128xi32>
    %93 = arith.extui %92 : vector<2x128xi1> to vector<2x128xi32>
    %94 = arith.sitofp %93 : vector<2x128xi32> to vector<2x128xf32>
    %95 = arith.addf %87, %94 : vector<2x128xf32>
    %c128 = arith.constant 128 : index
    %c0_25 = arith.constant 0 : index
    %96 = vector.load %arg2[%c128, %c0_25] : memref<808x128xf32, #tpu.memory_space<vmem>>, vector<128x128xf32>
    %cst_26 = arith.constant dense<0.000000e+00> : vector<2x128xf32>
    %97 = tpu.matmul %95, %96, %cst_26 {dimension_numbers = #tpu.dot_dimension_numbers<[1], [0], [0], [1], [0, 0, 1, 1], [], []>} : vector<2x128xf32>, vector<128x128xf32>, vector<2x128xf32> -> vector<2x128xf32>
    %98 = vector.broadcast %5 : vector<1x128xf32> to vector<2x128xf32>
    %99 = arith.addf %97, %98 : vector<2x128xf32>
    %cst_27 = arith.constant 0.000000e+00 : f32
    %100 = vector.broadcast %cst_27 : f32 to vector<2x128xf32>
    %101 = arith.maximumf %99, %100 : vector<2x128xf32>
    %c256 = arith.constant 256 : index
    %c0_28 = arith.constant 0 : index
    %102 = vector.load %arg2[%c256, %c0_28] : memref<808x128xf32, #tpu.memory_space<vmem>>, vector<128x128xf32>
    %cst_29 = arith.constant dense<0.000000e+00> : vector<2x128xf32>
    %103 = tpu.matmul %101, %102, %cst_29 {dimension_numbers = #tpu.dot_dimension_numbers<[1], [0], [0], [1], [0, 0, 1, 1], [], []>} : vector<2x128xf32>, vector<128x128xf32>, vector<2x128xf32> -> vector<2x128xf32>
    %104 = vector.broadcast %6 : vector<1x128xf32> to vector<2x128xf32>
    %105 = arith.addf %103, %104 : vector<2x128xf32>
    %cst_30 = arith.constant 0.000000e+00 : f32
    %106 = vector.broadcast %cst_30 : f32 to vector<2x128xf32>
    %107 = arith.maximumf %105, %106 : vector<2x128xf32>
    %c512 = arith.constant 512 : index
    %c0_31 = arith.constant 0 : index
    %108 = vector.load %arg2[%c512, %c0_31] : memref<808x128xf32, #tpu.memory_space<vmem>>, vector<32x128xf32>
    %cst_32 = arith.constant dense<0.000000e+00> : vector<2x128xf32>
    %109 = tpu.matmul %61, %108, %cst_32 {dimension_numbers = #tpu.dot_dimension_numbers<[1], [0], [0], [1], [0, 0, 1, 1], [], []>} : vector<2x32xf32>, vector<32x128xf32>, vector<2x128xf32> -> vector<2x128xf32>
    %c544 = arith.constant 544 : index
    %c0_33 = arith.constant 0 : index
    %110 = vector.load %arg2[%c544, %c0_33] : memref<808x128xf32, #tpu.memory_space<vmem>>, vector<128x128xf32>
    %cst_34 = arith.constant dense<0.000000e+00> : vector<2x128xf32>
    %111 = tpu.matmul %107, %110, %cst_34 {dimension_numbers = #tpu.dot_dimension_numbers<[1], [0], [0], [1], [0, 0, 1, 1], [], []>} : vector<2x128xf32>, vector<128x128xf32>, vector<2x128xf32> -> vector<2x128xf32>
    %112 = arith.addf %109, %111 : vector<2x128xf32>
    %c672 = arith.constant 672 : index
    %c0_35 = arith.constant 0 : index
    %113 = vector.load %arg2[%c672, %c0_35] : memref<808x128xf32, #tpu.memory_space<vmem>>, vector<128x128xf32>
    %cst_36 = arith.constant dense<0.000000e+00> : vector<2x128xf32>
    %114 = tpu.matmul %75, %113, %cst_36 {dimension_numbers = #tpu.dot_dimension_numbers<[1], [0], [0], [1], [0, 0, 1, 1], [], []>} : vector<2x128xf32>, vector<128x128xf32>, vector<2x128xf32> -> vector<2x128xf32>
    %115 = arith.addf %112, %114 : vector<2x128xf32>
    %116 = vector.broadcast %7 : vector<1x128xf32> to vector<2x128xf32>
    %117 = arith.addf %115, %116 : vector<2x128xf32>
    %c0_37 = arith.constant 0 : index
    %c0_38 = arith.constant 0 : index
    %118 = vector.load %arg3[%c0_37, %c0_38] : memref<2x128xf32, #tpu.memory_space<vmem>>, vector<2x128xf32>
    tpu.vector_store %arg3[%c0_37, %c0_38], %117 {strides = array<i32>} : memref<2x128xf32, #tpu.memory_space<vmem>>, vector<2x128xf32>,
    return
  }
}

</mosaic_0001>

<bundles_post_ra>
// kernel: state_encoder_forward.1
= control target key start
LH: loop header
LB: loop body
LE: loop exit
PB: predicated region body
PF: predicated region fallthrough
CT: control target
= control target key end

     0   :  { %8 = vsyncpa [#allocation3], 0  ;;  %s1446_s0 = inlined_call_operand.vmem [shape: s32[4,2,8], index: 0, kind: input, shape index: {}]   ;;  %s1447_s1 = inlined_call_operand.vmem [shape: f32[2,1], index: 1, kind: input, shape index: {}]   ;;  %s1448_s2 = inlined_call_operand.hbm [shape: f32[808,128], index: 2, kind: input, shape index: {}]   ;;  %s1449_s3 = inlined_call_operand.hbm [shape: f32[2,128], index: 3, kind: output, shape index: {}]  }
   0x1   :  { %9 = vsyncpa [#allocation4], 0  ;;  %s1235_s12 = smov [#allocation2]  }
   0x2   :  { %s19_s13 = sshll.u32 %s1235_s12, 4  ;;  %s20_s13 = int_to_ptr.vmem [resolvable:$true] %s19_s13 }
   0x3   :  { %s1199_s14 = scalar_lea.vmem %s20_s13, 12928  ;;  %p1204_p1 = scmp.lt.s32.totalorder %s20_s13, %s20_s13 }
   0x4   :  { %p1200_p0 = scmp.ne.s32.totalorder %s20_s13, %s1199_s14  ;;  %p1205_p2 = scmp.lt.s32.totalorder %s1199_s14, %s1199_s14 }
   0x6   :  { %p1206_p3 = por %p1205_p2, %p1204_p1 }
   0x8   :  { %p1207_p4 = pnand %p1206_p3, %p1200_p0 }
   0xa   :  { %1210 = shalt.err (!%p1207_p4)
}
   0xb   :  { %s1236_s15 = smov 128   ;;  %s1237_s16 = smov 8  }
   0xc   :  { %25 = dma.hbm_to_vmem [thread:$0]  %s1448_s2, 12928, %s20_s13, [#allocation3], %s1236_s15, %s1236_s15, %s1237_s16  }
   0xd   :  { %1231 = dma.done.wait [#allocation3], 12928  }
   0xe   :  { %1232 = vsyncadd [#allocation3], 4294954368  ;;  %v30_v0 = vlaneseq  ;;  %v1238_v1 = vmov 1   ;;  %v1239_v2 = vmov 0   ;;  %v1240_v4 = vmov 0.0   ;;  %v122_v12 = vld [vmem:[#allocation2 + $0x78] sm:$0xff] }
   0xf   :  { %1180 = vset.pattern.permute.xlu1 %v1238_v1  ;;  %1179 = vset.pattern.permute.xlu0 %v1239_v2  ;;  %v829_v7 = vld [vmem:[%s1446_s0 + $0x2] sm:$0x3]  ;;  %v32_v8 = vld [vmem:[%s1446_s0] sm:$0x3]  ;;  %v832_v9 = vld [vmem:[%s1446_s0 + $0x4] sm:$0x3] }
  0x10   :  { %v1268_v3 = vshrl.u32 %v30_v0, 7  ;;  %984 = vmatprep.subr.mxu1 %v1240_v4  ;;  %949 = vmatprep.subr.mxu0 %v122_v12  ;;  %v121_v13 = vld [vmem:[#allocation2 + $0x70] sm:$0xff]  ;;  %v120_v16 = vld [vmem:[#allocation2 + $0x68] sm:$0xff]  ;;  %v119_v19 = vld [vmem:[#allocation2 + $0x60] sm:$0xff]  ;;  %vm1241_vm0 = vmmov 0   ;;  %v1316_v49 = vand.u32 127, %v30_v0 }
  0x11   :  { %950 = vmatpush3.msra.mxu0 %v122_v12  ;;  %v837_v20 = vld [vmem:[%s1446_s0 + $0x6] sm:$0x3]  ;;  %v118_v21 = vld [vmem:[#allocation2 + $0x58] sm:$0xff]  ;;  %v117_v23 = vld [vmem:[#allocation2 + $0x50] sm:$0xff]  ;;  %1016 = vmatprep.mubr.msk.f32.mxu1 %vm1241_vm0, %v1240_v4  ;;  %vm229_vm10 = vcmask 261120   ;;  %vm645_vm11 = vcmask 1041409  }
  0x12   :  { %v1272_v5 = vsub.s32 0, %v1268_v3  ;;  %v1275_v6 = vsub.s32 1, %v1268_v3  ;;  %951 = vmatprep.subr.mxu0 %v121_v13  ;;  %v363_v22 = vadd.s32 11, %v837_v20  ;;  %v116_v24 = vld [vmem:[#allocation2 + $0x48] sm:$0xff]  ;;  %v115_v25 = vld [vmem:[#allocation2 + $0x40] sm:$0xff]  ;;  %v114_v26 = vld [vmem:[#allocation2 + $0x38] sm:$0xff] }
  0x13   :  { %952 = vmatpush3.msra.mxu0 %v121_v13  ;;  %v113_v27 = vld [vmem:[#allocation2 + $0x30] sm:$0xff]  ;;  %v112_v28 = vld [vmem:[#allocation2 + $0x28] sm:$0xff]  ;;  %v111_v29 = vld [vmem:[#allocation2 + $0x20] sm:$0xff]  ;;  %vm226_vm9 = vcmp.lt.s32.totalorder %v1268_v3, 6  ;;  %s1243_s27 = smov [#allocation5]  }
  0x14   :  { %v60_v10 = vrot.slane %v829_v7, %v1272_v5  ;;  %v36_v11 = vrot.slane %v32_v8, %v1272_v5  ;;  %v67_v14 = vrot.slane %v829_v7, %v1275_v6  ;;  %v86_v15 = vrot.slane %v832_v9, %v1272_v5  ;;  %953 = vmatprep.subr.mxu0 %v120_v16  ;;  %v110_v30 = vld [vmem:[#allocation2 + $0x18] sm:$0xff]  ;;  %v109_v31 = vld [vmem:[#allocation2 + $0x10] sm:$0xff]  ;;  %v108_v32 = vld [vmem:[#allocation2 + $0x8] sm:$0xff]  ;;  %s818_s28 = sshll.u32 %s1243_s27, 4  ;;  %s819_s28 = int_to_ptr.vmem [resolvable:$true] %s818_s28 }
  0x15   :  { %v43_v17 = vrot.slane %v32_v8, %v1275_v6  ;;  %v93_v18 = vrot.slane %v832_v9, %v1275_v6  ;;  %954 = vmatpush3.msra.mxu0 %v120_v16  ;;  %v107_v33 = vld [vmem:[#allocation2] sm:$0xff]  ;;  %v278_v35 = vld [vmem:[#allocation2 + $0x1f8] sm:$0xff]  ;;  %v277_v36 = vld [vmem:[#allocation2 + $0x1f0] sm:$0xff]  ;;  %s1211_s29 = scalar_lea.vmem %s819_s28, 32  ;;  %p1216_p6 = scmp.lt.s32.totalorder %s819_s28, %s819_s28 }
  0x16   :  { %62 = vbcast.lane.b32.xlu0 %v60_v10, 256  ;;  %38 = vbcast.lane.b32.xlu1 %v36_v11, 256  ;;  %v246_v34 = vld [vmem:[%s1447_s1] sm:$0x3]  ;;  %v276_v37 = vld [vmem:[#allocation2 + $0x1e8] sm:$0xff]  ;;  %v274_v39 = vld [vmem:[#allocation2 + $0x1d8] sm:$0xff]  ;;  %p1212_p5 = scmp.ne.s32.totalorder %s819_s28, %s1211_s29  ;;  %p1217_p7 = scmp.lt.s32.totalorder %s1211_s29, %s1211_s29 }
  0x17   :  { %955 = vmatprep.subr.mxu0 %v119_v19  ;;  %985 = vmatpush3.msra.mxu1 %v278_v35  ;;  %v275_v38 = vld [vmem:[#allocation2 + $0x1e0] sm:$0xff]  ;;  %v273_v40 = vld [vmem:[#allocation2 + $0x1d0] sm:$0xff]  ;;  %v272_v41 = vld [vmem:[#allocation2 + $0x1c8] sm:$0xff]  ;;  %s1242_s1 = smov 96  }
  0x18   :  { %956 = vmatpush3.msra.mxu0 %v119_v19  ;;  %986 = vmatprep.subr.mxu1 %v1240_v4  ;;  %v271_v42 = vld [vmem:[#allocation2 + $0x1c0] sm:$0xff]  ;;  %v270_v43 = vld [vmem:[#allocation2 + $0x1b8] sm:$0xff]  ;;  %v269_v44 = vld [vmem:[#allocation2 + $0x1b0] sm:$0xff]  ;;  %p1218_p8 = por %p1217_p7, %p1216_p6 }
  0x19   :  { %957 = vmatprep.subr.mxu0 %v118_v21  ;;  %987 = vmatpush3.msra.mxu1 %v277_v36  ;;  %v268_v45 = vld [vmem:[#allocation2 + $0x1a8] sm:$0xff]  ;;  %v267_v46 = vld [vmem:[#allocation2 + $0x1a0] sm:$0xff]  ;;  %v266_v47 = vld [vmem:[#allocation2 + $0x198] sm:$0xff] }
  0x1a   :  { %69 = vbcast.lane.b32.xlu0 %v67_v14, 256  ;;  %88 = vbcast.lane.b32.xlu1 %v86_v15, 256  ;;  %v265_v48 = vld [vmem:[#allocation2 + $0x190] sm:$0xff]  ;;  %v386_v10 = vld [vmem:[#allocation2 + $0xf8] sm:$0xff]  ;;  %v384_v12 = vld [vmem:[#allocation2 + $0xe8] sm:$0xff]  ;;  %p1219_p9 = pnand %p1218_p8, %p1212_p5 }
  0x1b   :  { %958 = vmatpush3.msra.mxu0 %v118_v21  ;;  %988 = vmatprep.subr.mxu1 %v1240_v4  ;;  %v385_v11 = vld [vmem:[#allocation2 + $0xf0] sm:$0xff]  ;;  %v383_v13 = vld [vmem:[#allocation2 + $0xe0] sm:$0xff]  ;;  %v382_v14 = vld [vmem:[#allocation2 + $0xd8] sm:$0xff] }
  0x1c   :  { %959 = vmatprep.subr.mxu0 %v117_v23  ;;  %989 = vmatpush3.msra.mxu1 %v276_v37  ;;  %v381_v15 = vld [vmem:[#allocation2 + $0xd0] sm:$0xff]  ;;  %v380_v16 = vld [vmem:[#allocation2 + $0xc8] sm:$0xff] }
  0x1d   :  { %960 = vmatpush3.msra.mxu0 %v117_v23  ;;  %990 = vmatprep.subr.mxu1 %v1240_v4  ;;  %v377_v19 = vld [vmem:[#allocation2 + $0xb0] sm:$0xff]  ;;  %v375_v23 = vld [vmem:[#allocation2 + $0xa0] sm:$0xff] }
  0x1e   :  { %45 = vbcast.lane.b32.xlu0 %v43_v17, 256  ;;  %95 = vbcast.lane.b32.xlu1 %v93_v18, 256  ;;  %v379_v17 = vld [vmem:[#allocation2 + $0xc0] sm:$0xff]  ;;  %v378_v18 = vld [vmem:[#allocation2 + $0xb8] sm:$0xff] }
  0x1f   :  { %961 = vmatprep.subr.mxu0 %v116_v24  ;;  %991 = vmatpush3.msra.mxu1 %v275_v38 }
  0x20   :  { %962 = vmatpush3.msra.mxu0 %v116_v24  ;;  %992 = vmatprep.subr.mxu1 %v1240_v4  ;;  %v374_v24 = vld [vmem:[#allocation2 + $0x98] sm:$0xff] }
  0x21   :  { %963 = vmatprep.subr.mxu0 %v115_v25  ;;  %993 = vmatpush3.msra.mxu1 %v274_v39  ;;  %v264_v39 = vld [vmem:[#allocation2 + $0x188] sm:$0xff] }
  0x22   :  { %357 = vperm.xlu0 %1179, %v837_v20   ;;  %365 = vperm.xlu1 %1180, %v363_v22   ;;  %v376_v20 = vld [vmem:[#allocation2 + $0xa8] sm:$0xff] }
  0x23   :  { %964 = vmatpush3.msra.mxu0 %v115_v25  ;;  %994 = vmatprep.subr.mxu1 %v1240_v4  ;;  %v373_v25 = vld [vmem:[#allocation2 + $0x90] sm:$0xff] }
  0x24   :  { %965 = vmatprep.subr.mxu0 %v114_v26  ;;  %995 = vmatpush3.msra.mxu1 %v273_v40  ;;  %v263_v40 = vld [vmem:[#allocation2 + $0x180] sm:$0xff] }
  0x25   :  { %966 = vmatpush3.msra.mxu0 %v114_v26  ;;  %996 = vmatprep.subr.mxu1 %v1240_v4 }
  0x26   :  { %1181 = vset.pattern.permute.xlu1 %v1239_v2  ;;  %1182 = vset.pattern.permute.xlu0 %v1238_v1 }
  0x27   :  { %967 = vmatprep.subr.mxu0 %v113_v27  ;;  %249 = vperm.xlu1 %1181, %v246_v34  }
  0x28   :  { %968 = vmatpush3.msra.mxu0 %v113_v27  ;;  %997 = vmatpush3.msra.mxu1 %v272_v41  ;;  %v477_v41 = vld [vmem:[#allocation2 + $0x178] sm:$0xff] }
  0x29   :  { %969 = vmatprep.subr.mxu0 %v112_v28  ;;  %998 = vmatprep.subr.mxu1 %v1240_v4 }
  0x2a   :  { %970 = vmatpush3.msra.mxu0 %v112_v28  ;;  %999 = vmatpush3.msra.mxu1 %v271_v42  ;;  %v372_v28 = vld [vmem:[#allocation2 + $0x88] sm:$0xff] }
  0x2b   :  { %971 = vmatprep.subr.mxu0 %v111_v29  ;;  %1000 = vmatprep.subr.mxu1 %v1240_v4  ;;  %v475_v42 = vld [vmem:[#allocation2 + $0x168] sm:$0xff] }
  0x2c   :  { %972 = vmatpush3.msra.mxu0 %v111_v29  ;;  %1001 = vmatpush3.msra.mxu1 %v270_v43  ;;  %v474_v43 = vld [vmem:[#allocation2 + $0x160] sm:$0xff] }
  0x2d   :  { %973 = vmatprep.subr.mxu0 %v110_v30  ;;  %1002 = vmatprep.subr.mxu1 %v1240_v4 }
  0x2e   :  { %974 = vmatpush3.msra.mxu0 %v110_v30  ;;  %1003 = vmatpush3.msra.mxu1 %v269_v44  ;;  %v371_v30 = vld [vmem:[#allocation2 + $0x80] sm:$0xff]  ;;  %v473_v44 = vld [vmem:[#allocation2 + $0x158] sm:$0xff] }
  0x2f   :  { %975 = vmatprep.subr.mxu0 %v109_v31  ;;  %1004 = vmatprep.subr.mxu1 %v1240_v4 }
  0x30   :  { %976 = vmatpush3.msra.mxu0 %v109_v31  ;;  %1005 = vmatpush3.msra.mxu1 %v268_v45  ;;  %v1354_v31 = vld [vmem:[#allocation2 + $0x320] sm:$0xff]  ;;  %v472_v45 = vld [vmem:[#allocation2 + $0x150] sm:$0xff] }
  0x31   :  { %977 = vmatprep.subr.mxu0 %v108_v32  ;;  %1006 = vmatprep.subr.mxu1 %v1240_v4 }
  0x32   :  { %978 = vmatpush3.msra.mxu0 %v108_v32  ;;  %1007 = vmatpush3.msra.mxu1 %v267_v46  ;;  %v259_v32 = vsub.s32 2, %v1268_v3  ;;  %v471_v46 = vld [vmem:[#allocation2 + $0x148] sm:$0xff] }
  0x33   :  { %979 = vmatprep.subr.mxu0 %v107_v33  ;;  %1008 = vmatprep.subr.mxu1 %v1240_v4 }
  0x34   :  { %980 = vmatpush3.msra.mxu0 %v107_v33  ;;  %1009 = vmatpush3.msra.mxu1 %v266_v47  ;;  %v255_v33 = vrot.slane %v1354_v31, %v1275_v6  ;;  %v260_v36 = vrot.slane %v1354_v31, %v259_v32  ;;  %v476_v6 = vld [vmem:[#allocation2 + $0x170] sm:$0xff]  ;;  %v470_v47 = vld [vmem:[#allocation2 + $0x140] sm:$0xff] }
  0x35   :  { %1019 = vmatprep.subr.mxu0 %v1240_v4  ;;  %1010 = vmatprep.subr.mxu1 %v1240_v4  ;;  %v561_v32 = vld [vmem:[#allocation2 + $0x240] sm:$0xff] }
  0x36   :  { %1011 = vmatpush3.msra.mxu1 %v265_v48  ;;  %v469_v48 = vld [vmem:[#allocation2 + $0x138] sm:$0xff] }
  0x37   :  { %1012 = vmatprep.subr.mxu1 %v1240_v4 }
  0x38   :  { %1013 = vmatpush3.msra.mxu1 %v264_v39 }
  0x39   :  { %1014 = vmatprep.subr.mxu1 %v1240_v4 }
  0x3a   :  { %1015 = vmatpush3.msra.mxu1 %v263_v40 }
  0x3b   :  { %1054 = vmatprep.subr.mxu1 %v1240_v4 }
  0x88   :  { %v63_v50 = vpop.permute.xlu0 %62  ;;  %v39_v51 = vpop.permute.xlu1 %38 }
  0x89   :  { %v71_v52 = vadd.s32 11, %v63_v50  ;;  %vm47_vm2 = vcmp.eq.s32.totalorder %v1316_v49, %v39_v51  ;;  %v467_v50 = vld [vmem:[#allocation2 + $0x128] sm:$0xff]  ;;  %v466_v51 = vld [vmem:[#allocation2 + $0x120] sm:$0xff] }
  0x8a   :  { %v827_v58 = vsel %vm47_vm2, 1.0, %v1240_v4 }
  0x8b   :  { %vm73_vm1 = vcmp.eq.s32.totalorder %v1316_v49, %v71_v52  ;;  %v465_v52 = vld [vmem:[#allocation2 + $0x118] sm:$0xff] }
  0x8c   :  { %v70_v53 = vpop.permute.xlu0 %69  ;;  %v89_v54 = vpop.permute.xlu1 %88  ;;  %v830_v55 = vsel %vm73_vm1, 1.0, %v1240_v4 }
  0x8d   :  { %v72_v56 = vadd.s32 11, %v70_v53  ;;  %v97_v57 = vadd.s32 22, %v89_v54  ;;  %v79_v59 = vadd.f32 %v830_v55, %v827_v58  ;;  %v464_v53 = vld [vmem:[#allocation2 + $0x110] sm:$0xff]  ;;  %v463_v54 = vld [vmem:[#allocation2 + $0x108] sm:$0xff]  ;;  %v462_v55 = vld [vmem:[#allocation2 + $0x100] sm:$0xff] }
  0x8f   :  { %vm74_vm3 = vcmp.eq.s32.totalorder %v1316_v49, %v72_v56  ;;  %vm99_vm4 = vcmp.eq.s32.totalorder %v1316_v49, %v97_v57  ;;  %v126_v56 = vrot.slane %v1354_v31, %v1272_v5  ;;  %v389_v5 = vsub.s32 4, %v1268_v3 }
  0x90   :  { %v46_v60 = vpop.permute.xlu0 %45  ;;  %v96_v61 = vpop.permute.xlu1 %95  ;;  %v833_v62 = vsel %vm99_vm4, 1.0, %v1240_v4  ;;  %v831_v1 = vsel %vm74_vm3, 1.0, %v1240_v4 }
  0x91   :  { %vm48_vm5 = vcmp.eq.s32.totalorder %v1316_v49, %v46_v60  ;;  %v98_v63 = vadd.s32 22, %v96_v61  ;;  %v105_v0 = vadd.f32 %v833_v62, %v79_v59 }
  0x92   :  { %v828_v2 = vsel %vm48_vm5, 1.0, %v1240_v4 }
  0x93   :  { %v80_v7 = vadd.f32 %v831_v1, %v828_v2  ;;  %vm100_vm6 = vcmp.eq.s32.totalorder %v1316_v49, %v98_v63  ;;  %981 = vmatprep.mubr.f32.mxu0 %v105_v0 }
  0x94   :  { %v834_v8 = vsel %vm100_vm6, 1.0, %v1240_v4 }
  0x95   :  { %v106_v9 = vadd.f32 %v834_v8, %v80_v7  ;;  %v390_v7 = vrot.slane %v1354_v31, %v389_v5  ;;  %v726_v5 = vld [vmem:[#allocation2 + $0x2d8] sm:$0xff] }
  0x97   :  { %982 = vmatmul.mubr.f32.vlgmr.msra.gmra.mxu0 %v106_v9 }
  0x98   :  { %1020 = vmatpush3.msra.mxu0 %v386_v10  ;;  %1051 = vmatprep.mubr.msk.f32.mxu0 %vm1241_vm0, %v1240_v4 }
  0x99   :  { %1021 = vmatprep.subr.mxu0 %v1240_v4 }
  0x9a   :  { %1022 = vmatpush3.msra.mxu0 %v385_v11 }
  0x9b   :  { %1023 = vmatprep.subr.mxu0 %v1240_v4 }
  0x9c   :  { %1024 = vmatpush3.msra.mxu0 %v384_v12 }
  0x9d   :  { %1025 = vmatprep.subr.mxu0 %v1240_v4  ;;  %v358_v21 = vpop.permute.xlu0 %357  ;;  %v366_v22 = vpop.permute.xlu1 %365 }
  0x9e   :  { %1026 = vmatpush3.msra.mxu0 %v383_v13  ;;  %vm359_vm7 = vcmp.eq.s32.totalorder %v1316_v49, %v358_v21  ;;  %vm367_vm8 = vcmp.eq.s32.totalorder %v1316_v49, %v366_v22  ;;  %v468_v49 = vld [vmem:[#allocation2 + $0x130] sm:$0xff]  ;;  %v556_v13 = vld [vmem:[#allocation2 + $0x218] sm:$0xff]  ;;  %v570_v22 = vld [vmem:[#allocation2 + $0x288] sm:$0xff] }
  0x9f   :  { %1027 = vmatprep.subr.mxu0 %v1240_v4  ;;  %v838_v26 = vsel %vm359_vm7, 1.0, %v1240_v4  ;;  %v839_v27 = vsel %vm367_vm8, 1.0, %v1240_v4  ;;  %v571_v21 = vld [vmem:[#allocation2 + $0x290] sm:$0xff] }
  0xa0   :  { %1028 = vmatpush3.msra.mxu0 %v382_v14  ;;  %v370_v29 = vadd.f32 %v839_v27, %v838_v26  ;;  %v566_v26 = vld [vmem:[#allocation2 + $0x268] sm:$0xff]  ;;  %v565_v27 = vld [vmem:[#allocation2 + $0x260] sm:$0xff] }
  0xa1   :  { %1029 = vmatprep.subr.mxu0 %v1240_v4 }
  0xa2   :  { %1030 = vmatpush3.msra.mxu0 %v381_v15  ;;  %v250_v34 = vpop.permute.xlu1 %249  ;;  %v555_v15 = vld [vmem:[#allocation2 + $0x210] sm:$0xff] }
  0xa3   :  { %1031 = vmatprep.subr.mxu0 %v1240_v4  ;;  %v256_v35 = vmul.f32 %v255_v33, %v250_v34  ;;  %v560_v33 = vld [vmem:[#allocation2 + $0x238] sm:$0xff]  ;;  %v559_v34 = vld [vmem:[#allocation2 + $0x230] sm:$0xff] }
  0xa4   :  { %1032 = vmatpush3.msra.mxu0 %v380_v16  ;;  %v554_v16 = vld [vmem:[#allocation2 + $0x208] sm:$0xff] }
  0xa5   :  { %1033 = vmatprep.subr.mxu0 %v1240_v4  ;;  %v261_v37 = vadd.f32 %v260_v36, %v256_v35  ;;  %v558_v35 = vld [vmem:[#allocation2 + $0x228] sm:$0xff]  ;;  %v557_v36 = vld [vmem:[#allocation2 + $0x220] sm:$0xff] }
  0xa6   :  { %1034 = vmatpush3.msra.mxu0 %v379_v17  ;;  %v553_v17 = vld [vmem:[#allocation2 + $0x200] sm:$0xff] }
  0xa7   :  { %1035 = vmatprep.subr.mxu0 %v1240_v4  ;;  %v262_v38 = vmax.f32 %v261_v37, 0.0 }
  0xa8   :  { %1036 = vmatpush3.msra.mxu0 %v378_v18 }
  0xa9   :  { %1037 = vmatprep.subr.mxu0 %v1240_v4  ;;  %1017 = vmatmul.mubr.f32.vlgmr.msra.gmra.mxu1 %v262_v38 }
  0xaa   :  { %1038 = vmatpush3.msra.mxu0 %v377_v19  ;;  %1086 = vmatprep.mubr.msk.f32.mxu1 %vm1241_vm0, %v1240_v4 }
  0xab   :  { %1039 = vmatprep.subr.mxu0 %v1240_v4  ;;  %1055 = vmatpush3.msra.mxu1 %v477_v41 }
  0xac   :  { %1040 = vmatpush3.msra.mxu0 %v376_v20  ;;  %1056 = vmatprep.subr.mxu1 %v1240_v4  ;;  %v572_v20 = vld [vmem:[#allocation2 + $0x298] sm:$0xff] }
  0xad   :  { %1041 = vmatprep.subr.mxu0 %v1240_v4  ;;  %1057 = vmatpush3.msra.mxu1 %v476_v6 }
  0xae   :  { %1042 = vmatpush3.msra.mxu0 %v375_v23  ;;  %1058 = vmatprep.subr.mxu1 %v1240_v4  ;;  %v569_v23 = vld [vmem:[#allocation2 + $0x280] sm:$0xff] }
  0xaf   :  { %1043 = vmatprep.subr.mxu0 %v1240_v4  ;;  %1059 = vmatpush3.msra.mxu1 %v475_v42 }
  0xb0   :  { %1044 = vmatpush3.msra.mxu0 %v374_v24  ;;  %1060 = vmatprep.subr.mxu1 %v1240_v4  ;;  %v568_v24 = vld [vmem:[#allocation2 + $0x278] sm:$0xff] }
  0xb1   :  { %1045 = vmatprep.subr.mxu0 %v1240_v4  ;;  %1061 = vmatpush3.msra.mxu1 %v474_v43 }
  0xb2   :  { %1046 = vmatpush3.msra.mxu0 %v373_v25  ;;  %1062 = vmatprep.subr.mxu1 %v1240_v4  ;;  %v567_v25 = vld [vmem:[#allocation2 + $0x270] sm:$0xff] }
  0xb3   :  { %1047 = vmatprep.subr.mxu0 %v1240_v4  ;;  %1063 = vmatpush3.msra.mxu1 %v473_v44 }
  0xb4   :  { %1048 = vmatpush3.msra.mxu0 %v372_v28  ;;  %1064 = vmatprep.subr.mxu1 %v1240_v4  ;;  %v564_v28 = vld [vmem:[#allocation2 + $0x258] sm:$0xff] }
  0xb5   :  { %1049 = vmatprep.subr.mxu0 %v1240_v4  ;;  %1065 = vmatpush3.msra.mxu1 %v472_v45 }
  0xb6   :  { %1050 = vmatpush3.msra.mxu0 %v371_v30  ;;  %1066 = vmatprep.subr.mxu1 %v1240_v4  ;;  %v562_v30 = vld [vmem:[#allocation2 + $0x248] sm:$0xff] }
  0xb7   :  { %1052 = vmatmul.mubr.f32.vlgmr.msra.gmra.mxu0 %v370_v29  ;;  %1089 = vmatprep.subr.mxu0 %v1240_v4  ;;  %v563_v29 = vld [vmem:[#allocation2 + $0x250] sm:$0xff] }
  0xb8   :  { %1121 = vmatprep.mubr.msk.f32.mxu0 %vm1241_vm0, %v1240_v4  ;;  %1067 = vmatpush3.msra.mxu1 %v471_v46 }
  0xb9   :  { %1068 = vmatprep.subr.mxu1 %v1240_v4  ;;  %1090 = vmatpush3.msra.mxu0 %v572_v20 }
  0xba   :  { %1069 = vmatpush3.msra.mxu1 %v470_v47  ;;  %1091 = vmatprep.subr.mxu0 %v1240_v4 }
  0xbb   :  { %1070 = vmatprep.subr.mxu1 %v1240_v4  ;;  %1092 = vmatpush3.msra.mxu0 %v571_v21 }
  0xbc   :  { %1071 = vmatpush3.msra.mxu1 %v469_v48  ;;  %1093 = vmatprep.subr.mxu0 %v1240_v4 }
  0xbd   :  { %1072 = vmatprep.subr.mxu1 %v1240_v4  ;;  %1094 = vmatpush3.msra.mxu0 %v570_v22 }
  0xbe   :  { %1073 = vmatpush3.msra.mxu1 %v468_v49  ;;  %1095 = vmatprep.subr.mxu0 %v1240_v4 }
  0xbf   :  { %1074 = vmatprep.subr.mxu1 %v1240_v4  ;;  %1096 = vmatpush3.msra.mxu0 %v569_v23 }
  0xc0   :  { %1075 = vmatpush3.msra.mxu1 %v467_v50  ;;  %1097 = vmatprep.subr.mxu0 %v1240_v4 }
  0xc1   :  { %1076 = vmatprep.subr.mxu1 %v1240_v4  ;;  %1098 = vmatpush3.msra.mxu0 %v568_v24 }
  0xc2   :  { %1077 = vmatpush3.msra.mxu1 %v466_v51  ;;  %1099 = vmatprep.subr.mxu0 %v1240_v4 }
  0xc3   :  { %1078 = vmatprep.subr.mxu1 %v1240_v4  ;;  %1100 = vmatpush3.msra.mxu0 %v567_v25 }
  0xc4   :  { %1079 = vmatpush3.msra.mxu1 %v465_v52  ;;  %1101 = vmatprep.subr.mxu0 %v1240_v4 }
  0xc5   :  { %1080 = vmatprep.subr.mxu1 %v1240_v4  ;;  %1102 = vmatpush3.msra.mxu0 %v566_v26 }
  0xc6   :  { %1081 = vmatpush3.msra.mxu1 %v464_v53  ;;  %1103 = vmatprep.subr.mxu0 %v1240_v4 }
  0xc7   :  { %1082 = vmatprep.subr.mxu1 %v1240_v4  ;;  %1104 = vmatpush3.msra.mxu0 %v565_v27 }
  0xc8   :  { %1083 = vmatpush3.msra.mxu1 %v463_v54  ;;  %1105 = vmatprep.subr.mxu0 %v1240_v4 }
  0xc9   :  { %1084 = vmatprep.subr.mxu1 %v1240_v4  ;;  %1106 = vmatpush3.msra.mxu0 %v564_v28  ;;  %v808_v28 = vsub.s32 6, %v1268_v3 }
  0xca   :  { %1085 = vmatpush3.msra.mxu1 %v462_v55  ;;  %1107 = vmatprep.subr.mxu0 %v1240_v4 }
  0xcb   :  { %1124 = vmatprep.subr.mxu1 %v1240_v4  ;;  %1108 = vmatpush3.msra.mxu0 %v563_v29 }
  0xcc   :  { %1109 = vmatprep.subr.mxu0 %v1240_v4 }
  0xcd   :  { %1110 = vmatpush3.msra.mxu0 %v562_v30 }
  0xce   :  { %1111 = vmatprep.subr.mxu0 %v1240_v4 }
  0xcf   :  { %1112 = vmatpush3.msra.mxu0 %v561_v32 }
  0xd0   :  { %1113 = vmatprep.subr.mxu0 %v1240_v4 }
  0xd1   :  { %1114 = vmatpush3.msra.mxu0 %v560_v33 }
  0xd2   :  { %1115 = vmatprep.subr.mxu0 %v1240_v4 }
  0xd3   :  { %1116 = vmatpush3.msra.mxu0 %v559_v34 }
  0xd4   :  { %1117 = vmatprep.subr.mxu0 %v1240_v4 }
  0xd5   :  { %1118 = vmatpush3.msra.mxu0 %v558_v35 }
  0xd6   :  { %1119 = vmatprep.subr.mxu0 %v1240_v4 }
  0xd7   :  { %1120 = vmatpush3.msra.mxu0 %v557_v36 }
 0x157   :  { %v983_v57 = vpop.f32.mrf.mxu0 }
 0x158   :  { %v1382_v58 = vadd.f32 %v983_v57, %v126_v56 }
 0x159   :  { %v193_v59 = vpop.f32.mrf.mxu0 }
 0x15a   :  { %v836_v60 = vmul.f32 -1.442695, %v1382_v58  ;;  %v1385_v61 = vadd.f32 %v193_v59, %v126_v56 }
 0x15c   :  { %1183 = vpow2.f32 %v836_v60  ;;  %v835_v62 = vmul.f32 -1.442695, %v1385_v61  ;;  %v733_v60 = vld [vmem:[#allocation2 + $0x310] sm:$0xff] }
 0x15e   :  { %1185 = vpow2.f32 %v835_v62  ;;  %v731_v62 = vld [vmem:[#allocation2 + $0x300] sm:$0xff] }
 0x169   :  { %v1184_v63 = vpop.eup %1183  ;;  %v1396_v18 = vpop.f32.mrf.mxu1 }
 0x16a   :  { %v209_v0 = vadd.f32 1.0, %v1184_v63  ;;  %v730_v63 = vld [vmem:[#allocation2 + $0x2f8] sm:$0xff] }
 0x16b   :  { %v1186_v1 = vpop.eup %1185  ;;  %v1018_v19 = vpop.f32.mrf.mxu1 }
 0x16c   :  { %1187 = vrcp.f32 %v209_v0  ;;  %v208_v2 = vadd.f32 1.0, %v1186_v1  ;;  %v729_v0 = vld [vmem:[#allocation2 + $0x2f0] sm:$0xff]  ;;  %v728_v1 = vld [vmem:[#allocation2 + $0x2e8] sm:$0xff]  ;;  %v480_v19 = vsub.s32 5, %v1268_v3 }
 0x16e   :  { %1189 = vrcp.f32 %v208_v2  ;;  %v727_v2 = vld [vmem:[#allocation2 + $0x2e0] sm:$0xff]  ;;  %v481_v20 = vrot.slane %v1354_v31, %v480_v19 }
 0x177   :  { %v457_v8 = vpop.f32.mrf.mxu0 }
 0x178   :  { %v458_v9 = vadd.f32 %v457_v8, %v390_v7  ;;  %v725_v7 = vld [vmem:[#allocation2 + $0x2d0] sm:$0xff]  ;;  %v281_v8 = vsub.s32 3, %v1268_v3 }
 0x179   :  { %v1188_v10 = vpop.eup %1187  ;;  %v1053_v11 = vpop.f32.mrf.mxu0 }
 0x17a   :  { %v461_v12 = vmax.f32 %v458_v9, 0.0  ;;  %218 = vrot.lane.b32.xlu1 %v1188_v10, %s1242_s1  ;;  %v724_v9 = vld [vmem:[#allocation2 + $0x2c8] sm:$0xff]  ;;  %v723_v10 = vld [vmem:[#allocation2 + $0x2c0] sm:$0xff]  ;;  %v282_v11 = vrot.slane %v1354_v31, %v281_v8 }
 0x17b   :  { %v1190_v14 = vpop.eup %1189 }
 0x17c   :  { %1087 = vmatmul.mubr.f32.vlgmr.msra.gmra.mxu1 %v461_v12  ;;  %216 = vrot.lane.b32.xlu0 %v1190_v14, %s1242_s1  ;;  %v722_v12 = vld [vmem:[#allocation2 + $0x2b8] sm:$0xff]  ;;  %v721_v14 = vld [vmem:[#allocation2 + $0x2b0] sm:$0xff] }
 0x17d   :  { %1125 = vmatpush3.msra.mxu1 %v556_v13  ;;  %1132 = vmatprep.mubr.msk.f32.mxu1 %vm1241_vm0, %v1240_v4  ;;  %v350_v13 = vadd.f32 %v1396_v18, %v282_v11 }
 0x17e   :  { %1126 = vmatprep.subr.mxu1 %v1240_v4 }
 0x17f   :  { %1127 = vmatpush3.msra.mxu1 %v555_v15  ;;  %v720_v15 = vld [vmem:[#allocation2 + $0x2a8] sm:$0xff] }
 0x180   :  { %1128 = vmatprep.subr.mxu1 %v1240_v4 }
 0x181   :  { %1129 = vmatpush3.msra.mxu1 %v554_v16  ;;  %v353_v16 = vmax.f32 %v350_v13, 0.0 }
 0x182   :  { %1130 = vmatprep.subr.mxu1 %v1240_v4 }
 0x183   :  { %1131 = vmatpush3.msra.mxu1 %v553_v17  ;;  %v719_v17 = vld [vmem:[#allocation2 + $0x2a0] sm:$0xff] }
 0x184   :  { %1135 = vmatprep.subr.mxu1 %v1240_v4 }
 0x1ec   :  { %v219_v37 = vpop.permute.xlu1 %218 }
 0x1ed   :  { %v223_v38 = vmul.f32 %v219_v37, %v1382_v58  ;;  %v734_v58 = vld [vmem:[#allocation2 + $0x318] sm:$0xff] }
 0x1ee   :  { %v217_v39 = vpop.permute.xlu0 %216 }
 0x1ef   :  { %v228_v40 = vsel %vm226_vm9, %v223_v38, 0.0  ;;  %v222_v41 = vmul.f32 %v217_v39, %v1385_v61  ;;  %v732_v61 = vld [vmem:[#allocation2 + $0x308] sm:$0xff] }
 0x1f0   :  { %v237_v6 = vsel %vm229_vm10, %v228_v40, -inf }
 0x1f1   :  { %v238_v42 = vrot.slane %v237_v6, 4  ;;  %v227_v43 = vsel %vm226_vm9, %v222_v41, 0.0 }
 0x1f2   :  { %v230_v44 = vsel %vm229_vm10, %v227_v43, -inf }
 0x1f3   :  { %v239_v45 = vmax.f32 %v237_v6, %v238_v42  ;;  %v231_v46 = vrot.slane %v230_v44, 4 }
 0x1f5   :  { %v240_v47 = vrot.slane %v239_v45, 2  ;;  %v232_v48 = vmax.f32 %v230_v44, %v231_v46 }
 0x1f7   :  { %v241_v49 = vmax.f32 %v239_v45, %v240_v47  ;;  %v233_v50 = vrot.slane %v232_v48, 2 }
 0x1f9   :  { %v242_v51 = vrot.slane %v241_v49, 1  ;;  %v234_v52 = vmax.f32 %v232_v48, %v233_v50 }
 0x1fb   :  { %v243_v53 = vmax.f32 %v241_v49, %v242_v51  ;;  %v235_v54 = vrot.slane %v234_v52, 1 }
 0x1fd   :  { %v236_v55 = vmax.f32 %v234_v52, %v235_v54  ;;  %v245_v56 = vmax.f32 %v243_v53, 0.0 }
 0x1ff   :  { %v244_v57 = vmax.f32 %v236_v55, 0.0 }
 0x201   :  { %v646_v59 = vsel %vm645_vm11, %v245_v56, %v244_v57 }
 0x202   :  { %1133 = vmatmul.mubr.msk.f32.vlgmr.msra.gmra.mxu1 %vm229_vm10, %v646_v59 }
 0x203   :  { %1136 = vmatpush3.msra.mxu1 %v734_v58  ;;  %1167 = vmatprep.mubr.msk.f32.mxu1 %vm1241_vm0, %v1240_v4 }
 0x204   :  { %1137 = vmatprep.subr.mxu1 %v1240_v4 }
 0x205   :  { %1138 = vmatpush3.msra.mxu1 %v733_v60 }
 0x206   :  { %1139 = vmatprep.subr.mxu1 %v1240_v4 }
 0x207   :  { %1140 = vmatpush3.msra.mxu1 %v732_v61 }
 0x208   :  { %1141 = vmatprep.subr.mxu1 %v1240_v4 }
 0x209   :  { %1142 = vmatpush3.msra.mxu1 %v731_v62 }
 0x20a   :  { %1143 = vmatprep.subr.mxu1 %v1240_v4 }
 0x20b   :  { %1144 = vmatpush3.msra.mxu1 %v730_v63 }
 0x20c   :  { %1145 = vmatprep.subr.mxu1 %v1240_v4 }
 0x20d   :  { %1146 = vmatpush3.msra.mxu1 %v729_v0 }
 0x20e   :  { %1147 = vmatprep.subr.mxu1 %v1240_v4 }
 0x20f   :  { %1148 = vmatpush3.msra.mxu1 %v728_v1 }
 0x210   :  { %1149 = vmatprep.subr.mxu1 %v1240_v4 }
 0x211   :  { %1150 = vmatpush3.msra.mxu1 %v727_v2 }
 0x212   :  { %1151 = vmatprep.subr.mxu1 %v1240_v4 }
 0x213   :  { %1152 = vmatpush3.msra.mxu1 %v726_v5 }
 0x214   :  { %1153 = vmatprep.subr.mxu1 %v1240_v4 }
 0x215   :  { %1154 = vmatpush3.msra.mxu1 %v725_v7 }
 0x216   :  { %1155 = vmatprep.subr.mxu1 %v1240_v4 }
 0x217   :  { %1156 = vmatpush3.msra.mxu1 %v724_v9 }
 0x218   :  { %1157 = vmatprep.subr.mxu1 %v1240_v4 }
 0x219   :  { %1158 = vmatpush3.msra.mxu1 %v723_v10 }
 0x21a   :  { %1159 = vmatprep.subr.mxu1 %v1240_v4 }
 0x21b   :  { %1160 = vmatpush3.msra.mxu1 %v722_v12 }
 0x21c   :  { %1161 = vmatprep.subr.mxu1 %v1240_v4 }
 0x21d   :  { %1162 = vmatpush3.msra.mxu1 %v721_v14 }
 0x21e   :  { %1163 = vmatprep.subr.mxu1 %v1240_v4 }
 0x21f   :  { %1164 = vmatpush3.msra.mxu1 %v720_v15 }
 0x220   :  { %1165 = vmatprep.subr.mxu1 %v1240_v4  ;;  %v809_v4 = vrot.slane %v1354_v31, %v808_v28 }
 0x221   :  { %1166 = vmatpush3.msra.mxu1 %v719_v17 }
 0x222   :  { %1168 = vmatmul.mubr.f32.vlgmr.msra.gmra.mxu1 %v353_v16 }
 0x23c   :  { %v548_v18 = vpop.f32.mrf.mxu1 }
 0x23d   :  { %v549_v21 = vadd.f32 %v548_v18, %v481_v20 }
 0x23e   :  { %v1088_v22 = vpop.f32.mrf.mxu1 }
 0x23f   :  { %v552_v23 = vmax.f32 %v549_v21, 0.0 }
 0x241   :  { %1122 = vmatmul.mubr.f32.vlgmr.msra.gmra.mxu0 %v552_v23 }
 0x2c2   :  { %v715_v24 = vpop.f32.mrf.mxu1 }
 0x2c4   :  { %v1134_v25 = vpop.f32.mrf.mxu1 }
 0x2e2   :  { %v801_v26 = vpop.f32.mrf.mxu1 }
 0x2e4   :  { %v1169_v27 = vpop.f32.mrf.mxu1 }
 0x301   :  { %v639_v29 = vpop.f32.mrf.mxu0 }
 0x302   :  { %v716_v30 = vadd.f32 %v715_v24, %v639_v29 }
 0x303   :  { %v1123_v32 = vpop.f32.mrf.mxu0 }
 0x304   :  { %v805_v33 = vadd.f32 %v801_v26, %v716_v30 }
 0x306   :  { %v810_v34 = vadd.f32 %v809_v4, %v805_v33 }
 0x308   :  { %811 = vst [vmem:[#allocation5] sm:$0x3] %v810_v34 }
 0x309   :  { %1222 = shalt.err (!%p1219_p9)
}
 0x30a   :  { %821 = dma.vmem_to_hbm [thread:$0]  %s819_s28, 32, %s1449_s3, [#allocation4]  }
 0x30b   :  { %1233 = dma.done.wait [#allocation4], 32  }
 0x30c   :  { %1234 = vsyncadd [#allocation4], 4294967264 }
 0x30d   :  { %825 = vsyncpa [#allocation3], 1 }
 0x30e   :  { %826 = vsyncpa [#allocation4], 1 }

</bundles_post_ra>
